<compile_context>
chip_gen: v7x
topology: tpu7x:2x2x1
jax: 0.10.0
libtpu: 0.0.40
codegen_flags: <defaults>
</compile_context>

<pallas_src>
import jax
import jax.numpy as jnp
from jax.experimental import pallas as pl
from jax.experimental.pallas import tpu as pltpu


def _drop_path_kernel(x_ref, scale_ref, o_ref):
    # scale_ref: (bb, 1) in x.dtype, values in {0, 1/keep_prob};
    # broadcasts over the (bb, tnc) tile.  No cast on the hot path.
    o_ref[...] = x_ref[...] * scale_ref[...]


def _vmem_capacity_bytes():
    try:
        return int(pltpu.get_tpu_info().vmem_capacity_bytes)
    except Exception:
        return 64 << 20  # conservative (v7x per-TC VMEM)


def _sublane_granularity(batch, dtype):
    """Preferred sublane multiple for the batch block; None -> full-batch blocks."""
    itemsize = jnp.dtype(dtype).itemsize
    pref = 8 * max(1, 4 // itemsize)  # 8 for f32, 16 for bf16, 32 for int8/fp8
    if batch % pref == 0:
        return pref
    if batch % 8 == 0:
        return 8
    return None


def _largest_lane_tile(nc_p, max_elems):
    """Largest multiple of 128 dividing nc_p and <= max_elems (floor 128)."""
    best = 128
    t = 128
    limit = min(nc_p, max_elems)
    while t <= limit:
        if nc_p % t == 0:
            best = t
        t += 128
    return best


def _select_tiles(batch, nc_p, itemsize, target_tile_bytes, gran):
    """Pick (bb, tnc).  Prefer full contiguous rows (tnc == nc_p), then shrink bb."""
    row_bytes = nc_p * itemsize
    if gran is None:
        bb = batch
    else:
        by_budget = (target_tile_bytes // row_bytes) // gran * gran
        cand = min(batch, max(gran, by_budget))
        bb = gran
        while cand >= gran:
            if batch % cand == 0:
                bb = cand
                break
            cand -= gran
    if bb * row_bytes <= target_tile_bytes:
        tnc = nc_p
    else:
        tnc = _largest_lane_tile(nc_p, max(128, target_tile_bytes // (bb * itemsize)))
    return bb, tnc


def drop_path_pallas(x, drop_prob, seed, training=True):
    """Pallas DropPath. x: (B, ...). Returns array of same shape/dtype."""
    if drop_prob == 0.0 or not training:
        return x

    keep_prob = 1.0 - float(drop_prob)
    orig_shape = x.shape
    B = int(x.shape[0])
    nc = 1
    for d in x.shape[1:]:
        nc *= int(d)
    itemsize = jnp.dtype(x.dtype).itemsize

    # Per-sample keep mask in the wrapper (matches torch: floor(keep_prob + U)),
    # cast to x.dtype so the big-tile multiply never promotes to f32.
    key = jax.random.PRNGKey(seed)
    u = jax.random.uniform(key, (B, 1), dtype=jnp.float32)
    keep = jnp.floor(jnp.float32(keep_prob) + u)              # 0.0 or 1.0
    scale = (keep * (1.0 / jnp.float32(keep_prob))).astype(x.dtype)

    # --- tiling policy (per-generation VMEM budget) -------------------------
    vmem_cap = _vmem_capacity_bytes()
    target_tile_bytes = max(1 << 20, min(8 << 20, vmem_cap // 16))

    nc_p = ((nc + 127) // 128) * 128          # lane-dense last dim
    gran = _sublane_granularity(B, x.dtype)
    B_p = B
    if gran is None and B * 128 * itemsize > target_tile_bytes:
        # Full-batch blocks would blow the tile budget: pad B to a sublane
        # multiple instead (<= 7 extra rows of traffic).
        B_p = ((B + 7) // 8) * 8
        gran = _sublane_granularity(B_p, x.dtype)

    x2 = x.reshape(B, nc)
    if (B_p, nc_p) != (B, nc):
        x2 = jnp.pad(x2, ((0, B_p - B), (0, nc_p - nc)))
    if B_p != B:
        scale = jnp.pad(scale, ((0, B_p - B), (0, 0)))

    bb, tnc = _select_tiles(B_p, nc_p, itemsize, target_tile_bytes, gran)

    # v7x has 2 TensorCores: avoid a single-program grid when it can be split.
    if (B_p // bb) * (nc_p // tnc) == 1:
        if gran is not None and bb % (2 * gran) == 0:
            bb //= 2
        elif tnc % 256 == 0:
            tnc //= 2

    grid = (B_p // bb, nc_p // tnc)
    tile_bytes = bb * tnc * itemsize
    # Double-buffered in + out tiles plus slack for the tiny scale blocks.
    vmem_limit = int(min(vmem_cap * 3 // 4, max(32 << 20, 4 * tile_bytes + (1 << 20))))

    out = pl.pallas_call(
        _drop_path_kernel,
        out_shape=jax.ShapeDtypeStruct((B_p, nc_p), x.dtype),
        grid=grid,
        in_specs=[
            pl.BlockSpec((bb, tnc), lambda i, j: (i, j)),
            pl.BlockSpec((bb, 1), lambda i, j: (i, 0)),
        ],
        out_specs=pl.BlockSpec((bb, tnc), lambda i, j: (i, j)),
        compiler_params=pltpu.CompilerParams(
            dimension_semantics=("parallel", "parallel"),
            vmem_limit_bytes=vmem_limit,
        ),
        cost_estimate=pl.CostEstimate(
            flops=B_p * nc_p,
            transcendentals=0,
            bytes_accessed=2 * B_p * nc_p * itemsize + B_p * itemsize,
        ),
    )(x2, scale)

    if (B_p, nc_p) != (B, nc):
        out = out[:B, :nc]
    return out.reshape(orig_shape)


if __name__ == "__main__":
    def check(x, drop_prob, seed, rtol, atol):
        out = jax.block_until_ready(drop_path_pallas(x, drop_prob, seed, training=True))
        assert out.shape == x.shape and out.dtype == x.dtype
        keep_prob = 1.0 - drop_prob
        xf = x.astype(jnp.float32)
        of = out.astype(jnp.float32)
        for b in range(x.shape[0]):
            zero = bool(jnp.all(of[b] == 0.0))
            scaled = bool(jnp.allclose(of[b], xf[b] / keep_prob, rtol=rtol, atol=atol))
            assert zero or scaled, f"sample {b}: invalid drop-path output"
        return out

    key = jax.random.PRNGKey(0)

    # Main case: (B, N, C) ViT-style tokens, f32, lane-aligned N*C.
    B, N, C = 2, 8, 32
    x = jax.random.normal(key, (B, N, C), dtype=jnp.float32)
    check(x, 0.25, seed=0, rtol=1e-6, atol=1e-5)

    # Non-128-aligned feature size (exercises the padding path).
    x_odd = jax.random.normal(jax.random.PRNGKey(1), (4, 5, 7), dtype=jnp.float32)
    check(x_odd, 0.5, seed=3, rtol=1e-6, atol=1e-5)

    # bf16 input (exercises the dtype-aware sublane granularity).
    x_bf = jax.random.normal(jax.random.PRNGKey(2), (16, 8, 16), dtype=jnp.bfloat16)
    check(x_bf, 0.25, seed=7, rtol=2e-2, atol=1e-2)

    # Eval mode / drop_prob == 0 -> identity (no kernel launch needed).
    assert bool(jnp.all(drop_path_pallas(x, 0.25, seed=0, training=False) == x))
    assert bool(jnp.all(drop_path_pallas(x, 0.0, seed=0, training=True) == x))

    print("KERNEL_OK")
</pallas_src>

<mosaic_0001>
module attributes {stable_mosaic.version = 11 : i64} {
  func.func @_drop_path_kernel(%arg0: i32, %arg1: i32, %arg2: memref<2x128xf32, #tpu.memory_space<vmem>>, %arg3: memref<2x1xf32, #tpu.memory_space<vmem>>, %arg4: memref<2x128xf32, #tpu.memory_space<vmem>>) attributes {dimension_semantics = [#tpu.dimension_semantics<parallel>, #tpu.dimension_semantics<parallel>], iteration_bounds = array<i64: 1, 2>, scalar_prefetch = 0 : i64, scratch_operands = 0 : i64, tpu.core_type = #tpu.core_type<tc>, window_params = [{transform_indices = @transform_0, window_bounds = array<i64: 2, 128>}, {transform_indices = @transform_1, window_bounds = array<i64: 2, 1>}, {transform_indices = @transform_2, window_bounds = array<i64: 2, 128>}]} {
    %c0 = arith.constant 0 : index
    %c0_0 = arith.constant 0 : index
    %0 = vector.load %arg2[%c0, %c0_0] : memref<2x128xf32, #tpu.memory_space<vmem>>, vector<2x128xf32>
    %c0_1 = arith.constant 0 : index
    %c0_2 = arith.constant 0 : index
    %1 = vector.load %arg3[%c0_1, %c0_2] : memref<2x1xf32, #tpu.memory_space<vmem>>, vector<2x1xf32>
    %2 = vector.broadcast %1 : vector<2x1xf32> to vector<2x128xf32>
    %3 = arith.mulf %0, %2 : vector<2x128xf32>
    %c0_3 = arith.constant 0 : index
    %c0_4 = arith.constant 0 : index
    %4 = vector.load %arg4[%c0_3, %c0_4] : memref<2x128xf32, #tpu.memory_space<vmem>>, vector<2x128xf32>
    tpu.vector_store %arg4[%c0_3, %c0_4], %3 {strides = array<i32>} : memref<2x128xf32, #tpu.memory_space<vmem>>, vector<2x128xf32>,
    return
  }
  func.func @transform_0(%arg0: i32, %arg1: i32) -> (i32, i32) {
    %c0_i32 = arith.constant 0 : i32
    return %arg0, %arg1 : i32, i32
  }
  func.func @transform_1(%arg0: i32, %arg1: i32) -> (i32, i32) {
    %c0_i32 = arith.constant 0 : i32
    %c0_i32_0 = arith.constant 0 : i32
    return %arg0, %c0_i32 : i32, i32
  }
  func.func @transform_2(%arg0: i32, %arg1: i32) -> (i32, i32) {
    %c0_i32 = arith.constant 0 : i32
    return %arg0, %arg1 : i32, i32
  }
}

</mosaic_0001>

<bundles_post_ra>
// kernel: tpu_custom_call.1
= control target key start
LH: loop header
LB: loop body
LE: loop exit
PB: predicated region body
PF: predicated region fallthrough
CT: control target
= control target key end

     0   :  { %7 = vsyncpa [#allocation3], 0  ;;  %s701_s0 = inlined_call_operand.hbm [shape: f32[2,256], index: 0, kind: input, shape index: {}]   ;;  %s702_s1 = inlined_call_operand.vmem [shape: f32[2,1], index: 1, kind: input, shape index: {}]   ;;  %s703_s2 = inlined_call_operand.hbm [shape: f32[2,256], index: 2, kind: output, shape index: {}]  }
   0x1   :  { %9 = vsyncpa [#allocation3 + $0x1], 0 }
   0x2   :  { %10 = vsyncpa [#allocation4], 0 }
   0x3   :  { %12 = vsyncpa [#allocation4 + $0x1], 0  ;;  %s526_s9 = smov 0   ;;  %s528_s10 = smov 0  }
   0x4   :  { %s530_s11 = smov 0   ;;  %s532_s12 = smov 0  }
   0x5   :  { %s534_s13 = smov 0   ;;  %s536_s14 = smov 0  }
   0x6 LB: > { %s316_s15 = sadd.s32 4294967295, %s506_s14   ;;  %s317_s16 = sadd.s32 4294967294, %s506_s14   ;;  %s506_s14 = sphi %s536_s14, %s18_s14   ;;  %s502_s13 = sphi %s534_s13, %s719_s13   ;;  %s498_s12 = sphi %s532_s12, %s718_s12   ;;  %s494_s11 = sphi %s530_s11, %s717_s11   ;;  %s490_s10 = sphi %s528_s10, %s716_s10   ;;  %s486_s9 = sphi %s526_s9, %s715_s9  }
   0x7   : > { %s27_s17 = sadd.s32 1, %s502_s13  ;;  %s39_s18 = sadd.s32 1, %s494_s11 }
   0x8   : > { %p28_p0 = scmp.ge.s32.totalorder %s27_s17, 2  ;;  %p46_p1 = scmp.ne.s32.totalorder %s494_s11, %s490_s10 }
   0x9   : > { %p47_p2 = scmp.eq.s32.totalorder %s506_s14, 0  ;;  %p52_p3 = scmp.ne.s32.totalorder %s490_s10, %s486_s9 }
   0xa   : > { %s721_s17 = smov (%p28_p0, %s27_s17), 0  ;;  %p53_p5 = scmp.eq.s32.totalorder %s316_s15, 0 }
   0xb   : > { %p567_p4 = por %p47_p2, %p46_p1  ;;  %s35_s20 = ssub.s32 %s502_s13, %s721_s17 }
   0xc   : > { %p104_p6 = scmp.eq.s32.totalorder %s316_s15, 1  ;;  %p37_p7 = scmp.eq.s32.totalorder %s35_s20, 0 }
   0xd   : > { %p573_p8 = por %p53_p5, %p52_p3  ;;  %p110_p10 = scmp.eq.s32.totalorder %s317_s16, 1 }
   0xe   : > { %p577_p9 = por %p104_p6, %p46_p1  ;;  %p342_p13 = scmp.lt.s32.totalorder %s506_s14, 2 }
   0xf   : > { %s582_s23 = scalar_select %p37_p7, %s494_s11, %s39_s18  }
  0x10   : > { %s707_s22 = scalar_select %p577_p9, 1, 0 }
  0x11   : > { %p584_p11 = por %p110_p10, %p52_p3  ;;  %s137_s25 = sand.u32 1, %s494_s11  }
  0x12   : > { %s321_s26 = sshll.u32 %s137_s25, 1  ;;  %s322_s27 = sshll.u32 %s502_s13, 5 }
  0x13   : > { %s708_s24 = scalar_select %p584_p11, 1, 0 }
  0x14   : > { %s595_s30 = scalar_lea.hbm %s701_s0, %s322_s27  ;;  %s141_s3 = scalar_lea.vmem [#allocation2], %s321_s26 }
  0x15   : > { %s150_s4 = sshll.u32 %s141_s3, 4  ;;  %p601_p0 = pnand %p342_p13, %p567_p4  ;;  %s597_s4 = int_to_ptr.vmem [resolvable:$true] %s150_s4 }
  0x16   : > { %s138_s6 = scalar_lea.sflag [#allocation3], %s137_s25  ;;  %s394_s7 = scalar_lea.hbm %s595_s30, 32 }
  0x17   : > { %p395_p3 = scmp.ne.s32.totalorder %s595_s30, %s394_s7  ;;  %p396_p5 = pneg %p601_p0 }
  0x18   : > { %s399_s16 = scalar_lea.hbm %s701_s0, 64  ;;  %p400_p4 = scmp.lt.u32.totalorder %s595_s30, %s701_s0 }
  0x19   : > { %p397_p6 = pnand %p396_p5, %p395_p3  ;;  %p401_p10 = scmp.lt.u32.totalorder %s399_s16, %s394_s7 }
  0x1a   : > { %p403_p12 = scmp.lt.u32.totalorder %s394_s7, %s595_s30 }
  0x1b   : > { %p398_p7 = pneg %p397_p6  ;;  %p402_p13 = por %p401_p10, %p400_p4 }
  0x1d   : > { %p404_p1 = por %p403_p12, %p402_p13 }
  0x1f   : > { %p405_p2 = pnand %p404_p1, %p398_p7 }
  0x21   : > { %408 = shalt.err (!%p405_p2)
}
  0x22   : > { %s409_s20 = scalar_lea.vmem %s597_s4, 32  ;;  %s508_s25 = smov [#allocation2]  }
  0x23   : > { %p410_p3 = scmp.ne.s32.totalorder %s597_s4, %s409_s20  ;;  %s414_s26 = sshll.u32 %s508_s25, 4  ;;  %s415_s26 = int_to_ptr.vmem [resolvable:$false] %s414_s26 }
  0x24   : > { %s416_s27 = scalar_lea.vmem %s415_s26, 64  ;;  %p417_p9 = scmp.lt.s32.totalorder %s597_s4, %s415_s26 }
  0x25   : > { %p412_p6 = pnand %p410_p3, %p396_p5  ;;  %p418_p4 = scmp.lt.s32.totalorder %s416_s27, %s409_s20 }
  0x27   : > { %p413_p11 = pneg %p412_p6  ;;  %p419_p10 = por %p418_p4, %p417_p9 }
  0x29   : > { %p420_p12 = pnand %p419_p10, %p413_p11 }
  0x2b   : > { %423 = shalt.err (!%p420_p12)
}
  0x2c   : > { %337 = dma.hbm_to_vmem [thread:$0]  (!%p601_p0), %s595_s30, 32, %s597_s4, %s138_s6  }
  0x2d   : > { %p710_p1 = scmp.lt.s32.totalorder %s506_s14, 3  ;;  %p711_p2 = scmp.ge.s32.totalorder %s506_s14, 1 }
  0x2f   : > { %p156_p5 = pnand %p711_p2, %p710_p1 }
  0x30   : > { %s637_s28 = sand.u32 (!%p156_p5), 1, %s490_s10  }
  0x31   : > { %159 = sbr.rel (%p156_p5) target bundleno = 203 (0xcb), region = 28  ;;  %s324_s29 = sshll.u32 (!%p156_p5), %s637_s28, 1 }
  0x32   : > { %s162_s3 = scalar_lea.sflag (!%p156_p5), [#allocation3], %s637_s28  ;;  %s165_s7 = scalar_lea.vmem (!%p156_p5), [#allocation2], %s324_s29 }
  0x38   : > { %477 = dma.done.wait (%p573_p8), %s162_s3, 32  }
  0x39   : > { %479 = vsyncadd (%p573_p8), %s162_s3, 4294967264  ;;  %v509_v0 = vmov 0   ;;  %v195_v1 = vld [vmem:[%s702_s1] sm:$0x3]  ;;  %s327_s5 = sshll.u32 %s498_s12, 5  ;;  %s189_s6 = scalar_lea.vmem [#allocation5], %s324_s29 }
  0x3a   : > { %393 = vset.pattern.permute.xlu0 %v509_v0  ;;  %v194_v2 = vld [vmem:[%s165_s7] sm:$0x3]  ;;  %s219_s8 = sshll.u32 %s189_s6, 4  ;;  %s652_s21 = scalar_lea.hbm %s703_s2, %s327_s5  ;;  %s654_s8 = int_to_ptr.vmem [resolvable:$true] %s219_s8 }
  0x3b   : > { %198 = vperm.xlu0 %393, %v195_v1   ;;  %s204_s18 = scalar_lea.sflag [#allocation4], %s637_s28  ;;  %s424_s19 = scalar_lea.vmem %s654_s8, 32 }
  0x3c   : > { %p425_p8 = scmp.ne.s32.totalorder %s654_s8, %s424_s19  ;;  %p712_p9 = scmp.ne.s32.totalorder %s707_s22, 0 }
  0x3d   : > { %s510_s12 = smov [#allocation5]  }
  0x3e   : > { %p426_p11 = pnand %p425_p8, %p712_p9  ;;  %s428_s20 = sshll.u32 %s510_s12, 4  ;;  %s429_s20 = int_to_ptr.vmem [resolvable:$false] %s428_s20 }
  0x3f   : > { %s430_s25 = scalar_lea.vmem %s429_s20, 64  ;;  %p431_p7 = scmp.lt.s32.totalorder %s654_s8, %s429_s20 }
  0x40   : > { %p427_p0 = pneg %p426_p11  ;;  %p432_p13 = scmp.lt.s32.totalorder %s430_s25, %s424_s19 }
  0x42   : > { %p433_p3 = por %p432_p13, %p431_p7 }
  0x44   : > { %p434_p6 = pnand %p433_p3, %p427_p0 }
  0xba   : > { %v199_v3 = vpop.permute.xlu0 %198 }
  0xbb   : > { %v201_v4 = vmul.f32 %v199_v3, %v194_v2 }
  0xbd   : > { %202 = vst [vmem:[%s189_s6] sm:$0x3] %v201_v4 }
  0xbe   : > { %437 = shalt.err (!%p434_p6)
}
  0xbf   : > { %s438_s26 = scalar_lea.hbm %s652_s21, 32  ;;  %s442_s29 = scalar_lea.hbm %s703_s2, 64 }
  0xc0   : > { %p439_p4 = scmp.ne.s32.totalorder %s652_s21, %s438_s26  ;;  %p443_p1 = scmp.lt.u32.totalorder %s652_s21, %s703_s2 }
  0xc1   : > { %p444_p2 = scmp.lt.u32.totalorder %s442_s29, %s438_s26  ;;  %p446_p8 = scmp.lt.u32.totalorder %s438_s26, %s652_s21 }
  0xc2   : > { %p440_p10 = pnand %p439_p4, %p712_p9 }
  0xc3   : > { %p445_p5 = por %p444_p2, %p443_p1 }
  0xc4   : > { %p441_p12 = pneg %p440_p10 }
  0xc5   : > { %p447_p11 = por %p446_p8, %p445_p5 }
  0xc7   : > { %p448_p0 = pnand %p447_p11, %p441_p12 }
  0xc9   : > { %451 = shalt.err (!%p448_p0)
}
  0xca   : > { %332 = dma.vmem_to_hbm [thread:$0]  (%p712_p9), %s654_s8, 32, %s652_s21, %s204_s18  }
  0xcb PF: > { %s231_s30 = sand.u32 1, %s486_s9   ;;  %p713_p7 = scmp.ne.s32.totalorder %s708_s24, 0 }
  0xcc   : > { %p714_p13 = scmp.ge.s32.totalorder %s506_s14, 2  ;;  %s232_s4 = scalar_lea.sflag [#allocation4], %s231_s30 }
  0xce   : > { %p339_p3 = pnand %p714_p13, %p713_p7 }
  0xd0   : > { %481 = dma.done.wait (!%p339_p3), %s232_s4, 32  }
  0xd1   : > { %483 = vsyncadd (!%p339_p3), %s232_s4, 4294967264  ;;  %s18_s14 = sadd.s32 1, %s506_s14   ;;  %s715_s9 = smov %s490_s10 }
  0xd2   : > { %p15_p6 = scmp.ge.s32.totalorder %s18_s14, 4   ;;  %s716_s10 = smov %s494_s11 }
  0xd3   : > { %s717_s11 = smov %s582_s23  ;;  %s718_s12 = smov %s502_s13 }
  0xd4   : > { %s719_s13 = smov %s721_s17  ;;  %17 = sbr.rel (!%p15_p6) target bundleno = 6 (0x6), region = 76 }
  0xdb   :  { %237 = vsyncpa [#allocation3], 1 }
  0xdc   :  { %239 = vsyncpa [#allocation3 + $0x1], 1 }
  0xdd   :  { %240 = vsyncpa [#allocation4], 1 }
  0xde   :  { %242 = vsyncpa [#allocation4 + $0x1], 1 }

</bundles_post_ra>
